<compile_context>
chip_gen: v5e
topology: v5e:2x2
jax: 0.10.0
libtpu: 0.0.40
codegen_flags: <defaults>
</compile_context>

<pallas_src>
import jax
import jax.numpy as jnp
from jax.experimental import pallas as pl
from jax.experimental.pallas import tpu as pltpu


NEG_SLOPE = 0.1              # LeakyReLU negative slope used throughout the module
_VMEM_BUDGET = 28 << 20      # target block footprint for tiling selection
_VMEM_CAP = 46 << 20         # never request more than this (v7x has 64 MiB / TC)


def _leaky(x):
    return jnp.where(x > 0, x, NEG_SLOPE * x)


def _round_up(v, m):
    return ((v + m - 1) // m) * m


# ----------------------------------------------------------------------------
# Tiling selection + VMEM sizing
# ----------------------------------------------------------------------------

def _vmem_estimate(Bb, TL, Cin, Cout, K, R1, pad, itemsize):
    """Rough per-kernel VMEM footprint (bytes) for one tiling choice."""
    lane_pad = _round_up(max(pad, 1), 128)
    est = 2 * Bb * (Cin + Cout) * TL * itemsize               # streamed blocks (x2 buffers)
    est += 2 * (R1 * K * Cin + Cout * K * Cout) * itemsize    # weights (x2 buffers)
    est += 2 * (R1 + Cout) * 128 * 4                          # biases (lane padded)
    est += Bb * (Cin + Cout) * lane_pad * itemsize            # carried causal halos
    # live in-kernel temporaries (tap stacks + f32 results), unrolled over Bb
    est += Bb * (K * (Cin + Cout) * TL * itemsize + (R1 + 3 * Cout) * TL * 4)
    return est


def _select_tiling(B, L, Cin, Cout, K, R1, pad, itemsize, max_tl, max_bb):
    """Pick (Bb, TL): largest L-tile (multiple of 128, preferring clean divisors
    of L) and largest batch block dividing B whose footprint fits the budget."""
    max_tl = max(max_tl, 128)
    if L <= max_tl:
        tl_cands = [L]
    else:
        top = max((min(max_tl, L) // 128) * 128, 128)
        tl_cands = []
        for t in range(top, max(top // 2, 128) - 1, -128):    # prefer clean divisors
            if L % t == 0:
                tl_cands.append(t)
        for t in range(top, 127, -128):                       # then ragged tiles
            if t not in tl_cands:
                tl_cands.append(t)
    bb_cands = [d for d in range(min(B, max_bb), 0, -1) if B % d == 0]
    for tl in tl_cands:
        for bb in bb_cands:
            if _vmem_estimate(bb, tl, Cin, Cout, K, R1, pad, itemsize) <= _VMEM_BUDGET:
                return bb, tl
    return bb_cands[-1], tl_cands[-1]


# ----------------------------------------------------------------------------
# Fused TemporalBlock kernel
# ----------------------------------------------------------------------------

def _make_block_kernel(*, K, dilation, TL, Bb, Cin, Cout, pad,
                       has_down, use_scratch, compute_dtype):
    d = dilation

    def tap(cur, halo, s, rows):
        """Causally shifted view: out[:, j] = in[:, j - s] (halo covers [-pad, 0))."""
        if s == 0:
            return cur
        if halo is None:                        # single tile: halo is causal zeros
            if s >= TL:
                return jnp.zeros((rows, TL), compute_dtype)
            return jnp.concatenate(
                [jnp.zeros((rows, s), compute_dtype), cur[:, :TL - s]], axis=-1)
        if s >= TL:                             # whole tile comes from the halo
            return halo[:, pad - s: pad - s + TL]
        return jnp.concatenate([halo[:, pad - s:], cur[:, :TL - s]], axis=-1)

    def kernel(*refs):
        if use_scratch:
            x_ref, w1_ref, b1_ref, w2_ref, b2_ref, o_ref, xh_ref, hh_ref = refs
        else:
            x_ref, w1_ref, b1_ref, w2_ref, b2_ref, o_ref = refs
            xh_ref = hh_ref = None

        if use_scratch:
            @pl.when(pl.program_id(1) == 0)
            def _():
                # Causal zero padding for the first L-tile of each batch row.
                xh_ref[...] = jnp.zeros_like(xh_ref)
                hh_ref[...] = jnp.zeros_like(hh_ref)

        w1 = w1_ref[...]
        b1 = b1_ref[...]
        w2 = w2_ref[...]
        b2 = b2_ref[...]

        for bb in range(Bb):
            xc = x_ref[bb]                                     # (Cin, TL)
            xh = xh_ref[bb] if use_scratch else None           # (Cin, pad)

            # conv1 (+ fused 1x1 downsample rows): ONE MXU matmul with the K
            # dilated taps stacked along the contraction dim (tap k <-> x[l-k*d]).
            taps1 = [tap(xc, xh, k * d, Cin) for k in range(K)]
            x_stk = taps1[0] if K == 1 else jnp.concatenate(taps1, axis=0)
            z = jnp.dot(w1, x_stk, preferred_element_type=jnp.float32) + b1
            if has_down:
                h1 = _leaky(z[:Cout])                          # conv1 rows
                res = z[Cout:]                                 # downsample rows
            else:
                h1 = _leaky(z)
                res = xc.astype(jnp.float32)                   # identity residual
            # dropout1: identity (eval mode)
            h1c = h1.astype(compute_dtype)

            # conv2: same stacked-tap single matmul.
            hh = hh_ref[bb] if use_scratch else None           # (Cout, pad)
            taps2 = [tap(h1c, hh, k * d, Cout) for k in range(K)]
            h_stk = taps2[0] if K == 1 else jnp.concatenate(taps2, axis=0)
            h2 = _leaky(jnp.dot(w2, h_stk, preferred_element_type=jnp.float32) + b2)
            # dropout2: identity (eval mode)

            o_ref[bb] = _leaky(h2 + res).astype(o_ref.dtype)

            # Carry the causal halo (last `pad` x / h1 columns) to the next tile.
            if use_scratch:
                if pad <= TL:
                    xh_ref[bb] = xc[:, TL - pad:]
                    hh_ref[bb] = h1c[:, TL - pad:]
                else:
                    xh_ref[bb] = jnp.concatenate([xh[:, TL:], xc], axis=-1)
                    hh_ref[bb] = jnp.concatenate([hh[:, TL:], h1c], axis=-1)

    return kernel


def temporal_block_forward(x, block_params, kernel_size, dilation, *,
                           max_tl=1024, max_bb=4):
    """Run one TemporalBlock.  x: (B, Cin, L), Cin already padded to 8."""
    B, Cin, L = x.shape
    w1s, b1s, w2f, b2s, has_down, _ = block_params
    K = kernel_size
    Cout = w2f.shape[0]
    R1 = w1s.shape[0]
    assert w1s.shape[1] == K * Cin, "packed weight / input channel mismatch"
    assert R1 == (2 * Cout if has_down else Cout)
    pad = (K - 1) * dilation
    cdt = x.dtype
    itemsize = jnp.dtype(cdt).itemsize

    Bb, TL = _select_tiling(B, L, Cin, Cout, K, R1, pad, itemsize, max_tl, max_bb)
    NT = -(-L // TL)                         # ragged last tile handled by masking
    use_scratch = (pad > 0) and (NT > 1)

    kernel = _make_block_kernel(K=K, dilation=dilation, TL=TL, Bb=Bb, Cin=Cin,
                                Cout=Cout, pad=pad, has_down=has_down,
                                use_scratch=use_scratch, compute_dtype=cdt)

    in_specs = [
        pl.BlockSpec((Bb, Cin, TL), lambda b, t: (b, 0, t)),
        pl.BlockSpec(w1s.shape, lambda b, t: (0, 0)),
        pl.BlockSpec(b1s.shape, lambda b, t: (0, 0)),
        pl.BlockSpec(w2f.shape, lambda b, t: (0, 0)),
        pl.BlockSpec(b2s.shape, lambda b, t: (0, 0)),
    ]
    scratch = []
    if use_scratch:
        scratch = [pltpu.VMEM((Bb, Cin, pad), cdt),    # carried x halo
                   pltpu.VMEM((Bb, Cout, pad), cdt)]   # carried h1 halo

    est = _vmem_estimate(Bb, TL, Cin, Cout, K, R1, pad, itemsize)
    vmem_limit = int(min(max(est * 5 // 4 + (4 << 20), 24 << 20), _VMEM_CAP))

    return pl.pallas_call(
        kernel,
        out_shape=jax.ShapeDtypeStruct((B, Cout, L), cdt),
        grid_spec=pltpu.PrefetchScalarGridSpec(
            num_scalar_prefetch=0,
            grid=(B // Bb, NT),
            in_specs=in_specs,
            out_specs=pl.BlockSpec((Bb, Cout, TL), lambda b, t: (b, 0, t)),
            scratch_shapes=scratch,
        ),
        compiler_params=pltpu.CompilerParams(
            # t carries the causal halo in scratch -> must stay sequential;
            # the batch axis stays "parallel" (megacore friendly).
            dimension_semantics=("parallel", "arbitrary"),
            vmem_limit_bytes=vmem_limit),
    )(x, w1s, b1s, w2f, b2s)


def temporal_conv_net_forward(x, packed_params, kernel_size, *,
                              max_tl=1024, max_bb=4):
    """TemporalConvNet.forward: sequential TemporalBlocks with dilation 2**i."""
    B, C0, L = x.shape
    cdt = x.dtype
    cin_p0 = packed_params[0][0].shape[1] // kernel_size
    if cin_p0 != C0:  # pad input channels to the packed (8-aligned) width
        x = jnp.concatenate([x, jnp.zeros((B, cin_p0 - C0, L), cdt)], axis=1)
    out = x
    # TODO(synk): fusing 2-3 consecutive TemporalBlocks into one pallas_call
    # (inter-layer activations VMEM-resident) would further help HBM-bound
    # configs on v5e; not implemented here.
    for i, bp in enumerate(packed_params):
        out = temporal_block_forward(out, bp, kernel_size, 2 ** i,
                                     max_tl=max_tl, max_bb=max_bb)
    cout_last = packed_params[-1][5]
    if out.shape[1] != cout_last:
        out = out[:, :cout_last, :]
    return out


# ----------------------------------------------------------------------------
# Parameter construction (deterministic, mirrors the nn.Module __init__ shapes)
# ----------------------------------------------------------------------------

def fold_weight_norm(v, g):
    """weight_norm(dim=0): w = g * v / ||v||, norm over (Cin, K) per out channel."""
    norm = jnp.sqrt(jnp.sum(v * v, axis=(1, 2), keepdims=True))
    return g * v / norm


def init_tcn_params(key, num_inputs, num_channels, kernel_size):
    """Raw per-block params (torch layout):
       w1: (Cout, Cin, K)  b1: (Cout,)   w2: (Cout, Cout, K)  b2: (Cout,)
       wd: (Cout, Cin) or None           bd: (Cout,) or None"""
    params = []
    for i, out_ch in enumerate(num_channels):
        in_ch = num_inputs if i == 0 else num_channels[i - 1]
        key, k1, k2, k3, k4, k5, k6, k7, k8 = jax.random.split(key, 9)

        v1 = jax.random.normal(k1, (out_ch, in_ch, kernel_size), jnp.float32) * 0.3
        g1 = 1.0 + 0.1 * jax.random.normal(k2, (out_ch, 1, 1), jnp.float32)
        w1 = fold_weight_norm(v1, g1)
        b1 = jax.random.normal(k3, (out_ch,), jnp.float32) * 0.05

        v2 = jax.random.normal(k4, (out_ch, out_ch, kernel_size), jnp.float32) * 0.3
        g2 = 1.0 + 0.1 * jax.random.normal(k5, (out_ch, 1, 1), jnp.float32)
        w2 = fold_weight_norm(v2, g2)
        b2 = jax.random.normal(k6, (out_ch,), jnp.float32) * 0.05

        if in_ch != out_ch:
            wd = jax.random.normal(k7, (out_ch, in_ch), jnp.float32) * 0.3
            bd = jax.random.normal(k8, (out_ch,), jnp.float32) * 0.05
        else:
            wd, bd = None, None
        params.append((w1, b1, w2, b2, wd, bd))
    return params


def pack_tcn_params(raw_params, compute_dtype):
    """Kernel layout per block (channels zero-padded to multiples of 8):
       w1s: (R1, K*Cin_p)  conv1 weight with taps REVERSED and flattened so tap k
            pairs with x[l - k*d]; if the 1x1 downsample exists, its weight is
            row-stacked below (R1 = 2*Cout_p) in the tap-0 column block.
       b1s: (R1, 1) f32    conv1 bias (+ downsample bias rows)
       w2f: (Cout_p, K*Cout_p), b2s: (Cout_p, 1) f32
       has_down: bool; out_ch: original (unpadded) output channel count."""
    packed = []
    for (w1, b1, w2, b2, wd, bd) in raw_params:
        Cout, Cin, K = w1.shape
        Cip, Cop = _round_up(Cin, 8), _round_up(Cout, 8)
        w1p = jnp.zeros((Cop, Cip, K), jnp.float32).at[:Cout, :Cin].set(w1)
        w2p = jnp.zeros((Cop, Cop, K), jnp.float32).at[:Cout, :Cout].set(w2)
        b1p = jnp.zeros((Cop,), jnp.float32).at[:Cout].set(b1)
        b2p = jnp.zeros((Cop,), jnp.float32).at[:Cout].set(b2)
        # Reversed-tap flatten: column block k holds w[:, :, K-1-k].
        w1f = jnp.transpose(w1p[:, :, ::-1], (0, 2, 1)).reshape(Cop, K * Cip)
        w2f = jnp.transpose(w2p[:, :, ::-1], (0, 2, 1)).reshape(Cop, K * Cop)
        has_down = wd is not None
        if has_down:
            wdp = jnp.zeros((Cop, Cip), jnp.float32).at[:Cout, :Cin].set(wd)
            bdp = jnp.zeros((Cop,), jnp.float32).at[:Cout].set(bd)
            wdr = jnp.zeros((Cop, K * Cip), jnp.float32).at[:, :Cip].set(wdp)
            w1s = jnp.concatenate([w1f, wdr], axis=0)          # (2*Cop, K*Cip)
            b1s = jnp.concatenate([b1p, bdp], axis=0)
        else:
            w1s, b1s = w1f, b1p
        packed.append((
            w1s.astype(compute_dtype),
            b1s.reshape(-1, 1).astype(jnp.float32),
            w2f.astype(compute_dtype),
            b2p.reshape(-1, 1).astype(jnp.float32),
            has_down,
            Cout,
        ))
    return packed


# ----------------------------------------------------------------------------
# Pure-JAX reference (for a correctness check of the Pallas kernels)
# ----------------------------------------------------------------------------

def _ref_causal_conv1d(x, w, b, dilation):
    # w: (Cout, Cin, K); left-only padding == symmetric pad + Chomp1d
    K = w.shape[-1]
    pad = (K - 1) * dilation
    y = jax.lax.conv_general_dilated(
        x, w, window_strides=(1,), padding=[(pad, 0)],
        rhs_dilation=(dilation,), dimension_numbers=("NCH", "OIH", "NCH"))
    return y + b.reshape(1, -1, 1)


def ref_forward(x, raw_params, kernel_size):
    out = x
    for i, (w1, b1, w2, b2, wd, bd) in enumerate(raw_params):
        d = 2 ** i
        h = _leaky(_ref_causal_conv1d(out, w1, b1, d))
        h = _leaky(_ref_causal_conv1d(h, w2, b2, d))
        if wd is not None:
            res = jnp.einsum("oc,bcl->bol", wd, out) + bd.reshape(1, -1, 1)
        else:
            res = out
        out = _leaky(h + res)
    return out


if __name__ == "__main__":
    key = jax.random.PRNGKey(0)
    kx, kp, kx2, kp2, kx3, kp3 = jax.random.split(key, 6)

    # ---- test 1: tiny shapes, f32, single L tile (strict correctness) ----
    B, num_inputs, L = 2, 4, 16
    num_channels = [8, 8]
    ksz = 2
    x = jax.random.normal(kx, (B, num_inputs, L), jnp.float32)
    raw = init_tcn_params(kp, num_inputs, num_channels, ksz)

    packed_f32 = pack_tcn_params(raw, jnp.float32)
    out = jax.block_until_ready(temporal_conv_net_forward(x, packed_f32, ksz))
    ref = jax.block_until_ready(ref_forward(x, raw, ksz))
    assert out.shape == (B, num_channels[-1], L)
    assert jnp.allclose(out, ref, atol=1e-4, rtol=1e-4), "f32 mismatch vs reference"

    # ---- test 2: same shapes, bf16 compute / bf16 inter-layer activations ----
    packed_bf16 = pack_tcn_params(raw, jnp.bfloat16)
    out16 = temporal_conv_net_forward(x.astype(jnp.bfloat16), packed_bf16, ksz)
    out16 = jax.block_until_ready(out16).astype(jnp.float32)
    assert jnp.allclose(out16, ref, atol=1.5e-1, rtol=1.5e-1), "bf16 mismatch"

    # ---- test 3: longer sequence exercising the carried-halo L-tiling path ----
    B2, C0, L2 = 2, 4, 512
    chans2 = [16, 16]
    ksz2 = 3
    x2 = jax.random.normal(kx2, (B2, C0, L2), jnp.float32)
    raw2 = init_tcn_params(kp2, C0, chans2, ksz2)
    packed2 = pack_tcn_params(raw2, jnp.float32)
    out2 = jax.block_until_ready(
        temporal_conv_net_forward(x2, packed2, ksz2, max_tl=128))
    ref2 = jax.block_until_ready(ref_forward(x2, raw2, ksz2))
    assert out2.shape == (B2, chans2[-1], L2)
    assert jnp.allclose(out2, ref2, atol=1e-3, rtol=1e-3), "tiled mismatch"

    # ---- test 4: deep dilations (pad > tile) + ragged last tile ----
    B3, C3, L3 = 2, 8, 320
    chans3 = [8] * 8          # dilations 1..128 -> pad up to 256 > TL=128
    ksz3 = 3
    x3 = jax.random.normal(kx3, (B3, C3, L3), jnp.float32)
    raw3 = init_tcn_params(kp3, C3, chans3, ksz3)
    packed3 = pack_tcn_params(raw3, jnp.float32)
    out3 = jax.block_until_ready(
        temporal_conv_net_forward(x3, packed3, ksz3, max_tl=128))
    ref3 = jax.block_until_ready(ref_forward(x3, raw3, ksz3))
    assert out3.shape == (B3, chans3[-1], L3)
    assert jnp.allclose(out3, ref3, atol=2e-3, rtol=2e-3), "deep/ragged mismatch"

    print("KERNEL_OK")
</pallas_src>

<mosaic_0001>
module attributes {stable_mosaic.version = 11 : i64} {
  func.func @kernel(%arg0: i32, %arg1: i32, %arg2: memref<2x8x16xf32, #tpu.memory_space<vmem>>, %arg3: memref<16x16xf32, #tpu.memory_space<vmem>>, %arg4: memref<16x1xf32, #tpu.memory_space<vmem>>, %arg5: memref<8x16xf32, #tpu.memory_space<vmem>>, %arg6: memref<8x1xf32, #tpu.memory_space<vmem>>, %arg7: memref<2x8x16xf32, #tpu.memory_space<vmem>>) attributes {dimension_semantics = [#tpu.dimension_semantics<parallel>, #tpu.dimension_semantics<arbitrary>], iteration_bounds = array<i64: 1, 1>, scalar_prefetch = 0 : i64, scratch_operands = 0 : i64, tpu.core_type = #tpu.core_type<tc>, window_params = [{transform_indices = @transform_0, window_bounds = array<i64: 2, 8, 16>}, {pipeline_mode = #tpu.pipeline_mode<synchronous>, transform_indices = @transform_1, window_bounds = array<i64: 16, 16>}, {pipeline_mode = #tpu.pipeline_mode<synchronous>, transform_indices = @transform_2, window_bounds = array<i64: 16, 1>}, {pipeline_mode = #tpu.pipeline_mode<synchronous>, transform_indices = @transform_3, window_bounds = array<i64: 8, 16>}, {pipeline_mode = #tpu.pipeline_mode<synchronous>, transform_indices = @transform_4, window_bounds = array<i64: 8, 1>}, {transform_indices = @transform_5, window_bounds = array<i64: 2, 8, 16>}]} {
    %c0 = arith.constant 0 : index
    %c0_0 = arith.constant 0 : index
    %0 = vector.load %arg3[%c0, %c0_0] : memref<16x16xf32, #tpu.memory_space<vmem>>, vector<16x16xf32>
    %c0_1 = arith.constant 0 : index
    %c0_2 = arith.constant 0 : index
    %1 = vector.load %arg4[%c0_1, %c0_2] : memref<16x1xf32, #tpu.memory_space<vmem>>, vector<16x1xf32>
    %c0_3 = arith.constant 0 : index
    %c0_4 = arith.constant 0 : index
    %2 = vector.load %arg5[%c0_3, %c0_4] : memref<8x16xf32, #tpu.memory_space<vmem>>, vector<8x16xf32>
    %c0_5 = arith.constant 0 : index
    %c0_6 = arith.constant 0 : index
    %3 = vector.load %arg6[%c0_5, %c0_6] : memref<8x1xf32, #tpu.memory_space<vmem>>, vector<8x1xf32>
    %c0_7 = arith.constant 0 : index
    %c0_8 = arith.constant 0 : index
    %c0_9 = arith.constant 0 : index
    %4 = vector.load %arg2[%c0_7, %c0_8, %c0_9] : memref<2x8x16xf32, #tpu.memory_space<vmem>>, vector<1x8x16xf32>
    %5 = vector.shape_cast %4 : vector<1x8x16xf32> to vector<8x16xf32>
    %cst = arith.constant 0.000000e+00 : f32
    %6 = vector.broadcast %cst : f32 to vector<8x1xf32>
    %7 = vector.extract_strided_slice %5 {offsets = [0, 0], sizes = [8, 15], strides = [1, 1]} : vector<8x16xf32> to vector<8x15xf32>
    %8 = tpu.concatenate %6, %7 in 1 : vector<8x1xf32>, vector<8x15xf32> -> vector<8x16xf32>
    %9 = tpu.concatenate %5, %8 in 0 : vector<8x16xf32>, vector<8x16xf32> -> vector<16x16xf32>
    %cst_10 = arith.constant dense<0.000000e+00> : vector<16x16xf32>
    %10 = tpu.matmul %0, %9, %cst_10 {dimension_numbers = #tpu.dot_dimension_numbers<[1], [0], [0], [1], [0, 0, 1, 1], [], []>} : vector<16x16xf32>, vector<16x16xf32>, vector<16x16xf32> -> vector<16x16xf32>
    %11 = vector.broadcast %1 : vector<16x1xf32> to vector<16x16xf32>
    %12 = arith.addf %10, %11 : vector<16x16xf32>
    %13 = vector.extract_strided_slice %12 {offsets = [0, 0], sizes = [8, 16], strides = [1, 1]} : vector<16x16xf32> to vector<8x16xf32>
    %cst_11 = arith.constant 0.000000e+00 : f32
    %14 = vector.broadcast %cst_11 : f32 to vector<8x16xf32>
    %15 = arith.cmpf ogt, %13, %14 : vector<8x16xf32>
    %cst_12 = arith.constant 1.000000e-01 : f32
    %16 = vector.broadcast %cst_12 : f32 to vector<8x16xf32>
    %17 = arith.mulf %16, %13 : vector<8x16xf32>
    %18 = arith.select %15, %13, %17 : vector<8x16xi1>, vector<8x16xf32>
    %19 = vector.extract_strided_slice %12 {offsets = [8, 0], sizes = [8, 16], strides = [1, 1]} : vector<16x16xf32> to vector<8x16xf32>
    %cst_13 = arith.constant 0.000000e+00 : f32
    %20 = vector.broadcast %cst_13 : f32 to vector<8x1xf32>
    %21 = vector.extract_strided_slice %18 {offsets = [0, 0], sizes = [8, 15], strides = [1, 1]} : vector<8x16xf32> to vector<8x15xf32>
    %22 = tpu.concatenate %20, %21 in 1 : vector<8x1xf32>, vector<8x15xf32> -> vector<8x16xf32>
    %23 = tpu.concatenate %18, %22 in 0 : vector<8x16xf32>, vector<8x16xf32> -> vector<16x16xf32>
    %cst_14 = arith.constant dense<0.000000e+00> : vector<8x16xf32>
    %24 = tpu.matmul %2, %23, %cst_14 {dimension_numbers = #tpu.dot_dimension_numbers<[1], [0], [0], [1], [0, 0, 1, 1], [], []>} : vector<8x16xf32>, vector<16x16xf32>, vector<8x16xf32> -> vector<8x16xf32>
    %25 = vector.broadcast %3 : vector<8x1xf32> to vector<8x16xf32>
    %26 = arith.addf %24, %25 : vector<8x16xf32>
    %cst_15 = arith.constant 0.000000e+00 : f32
    %27 = vector.broadcast %cst_15 : f32 to vector<8x16xf32>
    %28 = arith.cmpf ogt, %26, %27 : vector<8x16xf32>
    %cst_16 = arith.constant 1.000000e-01 : f32
    %29 = vector.broadcast %cst_16 : f32 to vector<8x16xf32>
    %30 = arith.mulf %29, %26 : vector<8x16xf32>
    %31 = arith.select %28, %26, %30 : vector<8x16xi1>, vector<8x16xf32>
    %32 = arith.addf %31, %19 : vector<8x16xf32>
    %cst_17 = arith.constant 0.000000e+00 : f32
    %33 = vector.broadcast %cst_17 : f32 to vector<8x16xf32>
    %34 = arith.cmpf ogt, %32, %33 : vector<8x16xf32>
    %cst_18 = arith.constant 1.000000e-01 : f32
    %35 = vector.broadcast %cst_18 : f32 to vector<8x16xf32>
    %36 = arith.mulf %35, %32 : vector<8x16xf32>
    %37 = arith.select %34, %32, %36 : vector<8x16xi1>, vector<8x16xf32>
    %c0_19 = arith.constant 0 : index
    %c0_20 = arith.constant 0 : index
    %c0_21 = arith.constant 0 : index
    %38 = vector.load %arg7[%c0_19, %c0_20, %c0_21] : memref<2x8x16xf32, #tpu.memory_space<vmem>>, vector<1x8x16xf32>
    %39 = vector.shape_cast %38 : vector<1x8x16xf32> to vector<8x16xf32>
    %40 = vector.shape_cast %37 : vector<8x16xf32> to vector<1x8x16xf32>
    tpu.vector_store %arg7[%c0_19, %c0_20, %c0_21], %40 {strides = array<i32>} : memref<2x8x16xf32, #tpu.memory_space<vmem>>, vector<1x8x16xf32>,
    %c1 = arith.constant 1 : index
    %c0_22 = arith.constant 0 : index
    %c0_23 = arith.constant 0 : index
    %41 = vector.load %arg2[%c1, %c0_22, %c0_23] : memref<2x8x16xf32, #tpu.memory_space<vmem>>, vector<1x8x16xf32>
    %42 = vector.shape_cast %41 : vector<1x8x16xf32> to vector<8x16xf32>
    %cst_24 = arith.constant 0.000000e+00 : f32
    %43 = vector.broadcast %cst_24 : f32 to vector<8x1xf32>
    %44 = vector.extract_strided_slice %42 {offsets = [0, 0], sizes = [8, 15], strides = [1, 1]} : vector<8x16xf32> to vector<8x15xf32>
    %45 = tpu.concatenate %43, %44 in 1 : vector<8x1xf32>, vector<8x15xf32> -> vector<8x16xf32>
    %46 = tpu.concatenate %42, %45 in 0 : vector<8x16xf32>, vector<8x16xf32> -> vector<16x16xf32>
    %cst_25 = arith.constant dense<0.000000e+00> : vector<16x16xf32>
    %47 = tpu.matmul %0, %46, %cst_25 {dimension_numbers = #tpu.dot_dimension_numbers<[1], [0], [0], [1], [0, 0, 1, 1], [], []>} : vector<16x16xf32>, vector<16x16xf32>, vector<16x16xf32> -> vector<16x16xf32>
    %48 = vector.broadcast %1 : vector<16x1xf32> to vector<16x16xf32>
    %49 = arith.addf %47, %48 : vector<16x16xf32>
    %50 = vector.extract_strided_slice %49 {offsets = [0, 0], sizes = [8, 16], strides = [1, 1]} : vector<16x16xf32> to vector<8x16xf32>
    %cst_26 = arith.constant 0.000000e+00 : f32
    %51 = vector.broadcast %cst_26 : f32 to vector<8x16xf32>
    %52 = arith.cmpf ogt, %50, %51 : vector<8x16xf32>
    %cst_27 = arith.constant 1.000000e-01 : f32
    %53 = vector.broadcast %cst_27 : f32 to vector<8x16xf32>
    %54 = arith.mulf %53, %50 : vector<8x16xf32>
    %55 = arith.select %52, %50, %54 : vector<8x16xi1>, vector<8x16xf32>
    %56 = vector.extract_strided_slice %49 {offsets = [8, 0], sizes = [8, 16], strides = [1, 1]} : vector<16x16xf32> to vector<8x16xf32>
    %cst_28 = arith.constant 0.000000e+00 : f32
    %57 = vector.broadcast %cst_28 : f32 to vector<8x1xf32>
    %58 = vector.extract_strided_slice %55 {offsets = [0, 0], sizes = [8, 15], strides = [1, 1]} : vector<8x16xf32> to vector<8x15xf32>
    %59 = tpu.concatenate %57, %58 in 1 : vector<8x1xf32>, vector<8x15xf32> -> vector<8x16xf32>
    %60 = tpu.concatenate %55, %59 in 0 : vector<8x16xf32>, vector<8x16xf32> -> vector<16x16xf32>
    %cst_29 = arith.constant dense<0.000000e+00> : vector<8x16xf32>
    %61 = tpu.matmul %2, %60, %cst_29 {dimension_numbers = #tpu.dot_dimension_numbers<[1], [0], [0], [1], [0, 0, 1, 1], [], []>} : vector<8x16xf32>, vector<16x16xf32>, vector<8x16xf32> -> vector<8x16xf32>
    %62 = vector.broadcast %3 : vector<8x1xf32> to vector<8x16xf32>
    %63 = arith.addf %61, %62 : vector<8x16xf32>
    %cst_30 = arith.constant 0.000000e+00 : f32
    %64 = vector.broadcast %cst_30 : f32 to vector<8x16xf32>
    %65 = arith.cmpf ogt, %63, %64 : vector<8x16xf32>
    %cst_31 = arith.constant 1.000000e-01 : f32
    %66 = vector.broadcast %cst_31 : f32 to vector<8x16xf32>
    %67 = arith.mulf %66, %63 : vector<8x16xf32>
    %68 = arith.select %65, %63, %67 : vector<8x16xi1>, vector<8x16xf32>
    %69 = arith.addf %68, %56 : vector<8x16xf32>
    %cst_32 = arith.constant 0.000000e+00 : f32
    %70 = vector.broadcast %cst_32 : f32 to vector<8x16xf32>
    %71 = arith.cmpf ogt, %69, %70 : vector<8x16xf32>
    %cst_33 = arith.constant 1.000000e-01 : f32
    %72 = vector.broadcast %cst_33 : f32 to vector<8x16xf32>
    %73 = arith.mulf %72, %69 : vector<8x16xf32>
    %74 = arith.select %71, %69, %73 : vector<8x16xi1>, vector<8x16xf32>
    %c1_34 = arith.constant 1 : index
    %c0_35 = arith.constant 0 : index
    %c0_36 = arith.constant 0 : index
    %75 = vector.load %arg7[%c1_34, %c0_35, %c0_36] : memref<2x8x16xf32, #tpu.memory_space<vmem>>, vector<1x8x16xf32>
    %76 = vector.shape_cast %75 : vector<1x8x16xf32> to vector<8x16xf32>
    %77 = vector.shape_cast %74 : vector<8x16xf32> to vector<1x8x16xf32>
    tpu.vector_store %arg7[%c1_34, %c0_35, %c0_36], %77 {strides = array<i32>} : memref<2x8x16xf32, #tpu.memory_space<vmem>>, vector<1x8x16xf32>,
    return
  }
  func.func @transform_0(%arg0: i32, %arg1: i32) -> (i32, i32, i32) {
    %c0_i32 = arith.constant 0 : i32
    %c0_i32_0 = arith.constant 0 : i32
    return %arg0, %c0_i32, %arg1 : i32, i32, i32
  }
  func.func @transform_1(%arg0: i32, %arg1: i32) -> (i32, i32) {
    %c0_i32 = arith.constant 0 : i32
    %c0_i32_0 = arith.constant 0 : i32
    %c0_i32_1 = arith.constant 0 : i32
    return %c0_i32, %c0_i32_0 : i32, i32
  }
  func.func @transform_2(%arg0: i32, %arg1: i32) -> (i32, i32) {
    %c0_i32 = arith.constant 0 : i32
    %c0_i32_0 = arith.constant 0 : i32
    %c0_i32_1 = arith.constant 0 : i32
    return %c0_i32, %c0_i32_0 : i32, i32
  }
  func.func @transform_3(%arg0: i32, %arg1: i32) -> (i32, i32) {
    %c0_i32 = arith.constant 0 : i32
    %c0_i32_0 = arith.constant 0 : i32
    %c0_i32_1 = arith.constant 0 : i32
    return %c0_i32, %c0_i32_0 : i32, i32
  }
  func.func @transform_4(%arg0: i32, %arg1: i32) -> (i32, i32) {
    %c0_i32 = arith.constant 0 : i32
    %c0_i32_0 = arith.constant 0 : i32
    %c0_i32_1 = arith.constant 0 : i32
    return %c0_i32, %c0_i32_0 : i32, i32
  }
  func.func @transform_5(%arg0: i32, %arg1: i32) -> (i32, i32, i32) {
    %c0_i32 = arith.constant 0 : i32
    %c0_i32_0 = arith.constant 0 : i32
    return %arg0, %c0_i32, %arg1 : i32, i32, i32
  }
}

</mosaic_0001>

<bundles_post_ra>
// kernel: tpu_custom_call.1
= control target key start
LH: loop header
LB: loop body
LE: loop exit
PB: predicated region body
PF: predicated region fallthrough
CT: control target
= control target key end

     0   :  { %10 = vsyncpa [#allocation3], 0  ;;  %s386_s0 = inlined_call_operand.vmem [shape: f32[2,8,16], index: 0, kind: input, shape index: {}]   ;;  %s387_s1 = inlined_call_operand.hbm [shape: f32[16,16], index: 1, kind: input, shape index: {}]   ;;  %s388_s2 = inlined_call_operand.vmem [shape: f32[16,1], index: 2, kind: input, shape index: {}]   ;;  %s389_s3 = inlined_call_operand.vmem [shape: f32[8,16], index: 3, kind: input, shape index: {}]   ;;  %s390_s4 = inlined_call_operand.vmem [shape: f32[8,1], index: 4, kind: input, shape index: {}]   ;;  %s391_s5 = inlined_call_operand.hbm [shape: f32[2,8,16], index: 5, kind: output, shape index: {}]  }
   0x1   :  { %11 = vsyncpa [#allocation4], 0  ;;  %s18_s20 = sshll.u32 %s387_s1, 4  ;;  %s296_s21 = smov [#allocation2]   ;;  %s19_s20 = int_to_ptr.hbm [resolvable:$true] %s18_s20 }
   0x2   :  { %s20_s22 = sshll.u32 %s296_s21, 4  ;;  %s297_s23 = smov 128   ;;  %s21_s22 = int_to_ptr.vmem [resolvable:$true] %s20_s22 }
   0x3   :  { %s298_s24 = smov 8  }
   0x4   :  { %26 = dma.hbm_to_vmem [thread:$0]  %s19_s20, 256, %s21_s22, [#allocation3], %s297_s23, %s297_s23, %s298_s24  }
   0x5   :  { %292 = dma.done.wait [#allocation3], 256  }
   0x6   :  { %293 = vsyncadd [#allocation3], 4294967040  ;;  %v227_v0 = vld [vmem:[%s386_s0 + $0x8] sm:$0xff]  ;;  %s299_s27 = smov 1   ;;  %v43_v1 = vld [vmem:[%s386_s0] sm:$0xff]  ;;  %v300_v3 = vmov 0  }
   0x7   :  { %137 = vrot.lane.b32.xlu0 %v227_v0, %s299_s27  ;;  %v39_v2 = vld [vmem:[%s388_s2] sm:$0xff]  ;;  %241 = vset.pattern.permute.xlu1 %v300_v3  ;;  %vm48_vm0 = vcmask 7168   ;;  %vm60_vm2 = vcmask 130048   ;;  %v38_v17 = vld [vmem:[#allocation2 + $0x8] sm:$0xff]  ;;  %s207_s12 = sshll.u32 %s391_s5, 4  ;;  %s208_s12 = int_to_ptr.hbm [resolvable:$true] %s207_s12 }
   0x8   :  { %243 = vset.pattern.permute.xlu0 %v300_v3  ;;  %52 = vperm.xlu1 %241, %v39_v2   ;;  %vm349_vm1 = vmneg %vm48_vm0  ;;  %v37_v6 = vld [vmem:[#allocation2] sm:$0xff]  ;;  %v40_v18 = vld [vmem:[%s388_s2 + $0x8] sm:$0xff]  ;;  %s301_s2 = smov [#allocation5]  }
   0x9   :  { %242 = vset.pattern.permute.xlu2 %v300_v3  ;;  %v42_v19 = vld [vmem:[%s390_s4] sm:$0xff] }
   0xa   :  { %v41_v21 = vld [vmem:[%s389_s3] sm:$0xff]  ;;  %s205_s3 = sshll.u32 %s301_s2, 4  ;;  %s206_s3 = int_to_ptr.vmem [resolvable:$true] %s205_s3 }
   0xf   :  { %45 = vrot.lane.b32.xlu0 %v43_v1, %s299_s27 }
  0x17   :  { %57 = vperm.xlu0 %243, %v40_v18  }
  0x79   :  { %v138_v5 = vpop.permute.xlu0 %137 }
  0x7a   :  { %229 = vmatpush.msk.msra.mxu2 %vm349_vm1, %v138_v5  ;;  %v53_v8 = vpop.permute.xlu1 %52 }
  0x7c   :  { %156 = vmatpush.msra.mxu2 %v227_v0 }
  0x7d   :  { %230 = vmatmul.msk.f32.vlgmr.msra.gmra.mxu2 %vm60_vm2, %v37_v6 }
  0x81   :  { %v46_v7 = vpop.permute.xlu0 %45 }
  0x82   :  { %221 = vmatpush.msk.msra.mxu0 %vm349_vm1, %v46_v7 }
  0x84   :  { %82 = vmatpush.msra.mxu0 %v43_v1 }
  0x85   :  { %222 = vmatmul.msk.f32.vlgmr.msra.gmra.mxu0 %vm60_vm2, %v37_v6  ;;  %231 = vmatmul.msk.f32.gmra.mxu2 %vm60_vm2, %v38_v17 }
  0x89   :  { %v58_v24 = vpop.permute.xlu0 %57 }
  0x8d   :  { %223 = vmatmul.msk.f32.gmra.mxu0 %vm60_vm2, %v38_v17 }
 0x100   :  { %v158_v9 = vpop.f32.mrf.mxu2 }
 0x101   :  { %v159_v10 = vadd.f32 %v158_v9, %v53_v8 }
 0x102   :  { %v84_v11 = vpop.f32.mrf.mxu0 }
 0x103   :  { %v165_v12 = vmul.f32 0.1, %v159_v10  ;;  %v85_v13 = vadd.f32 %v84_v11, %v53_v8  ;;  %vm164_vm3 = vcmp.gt.f32.partialorder %v159_v10, 0.0 }
 0x105   :  { %v166_v14 = vsel %vm164_vm3, %v159_v10, %v165_v12  ;;  %vm90_vm4 = vcmp.gt.f32.partialorder %v85_v13, 0.0  ;;  %v91_v15 = vmul.f32 0.1, %v85_v13 }
 0x106   :  { %168 = vrot.lane.b32.xlu1 %v166_v14, %s299_s27 }
 0x107   :  { %v92_v16 = vsel %vm90_vm4, %v85_v13, %v91_v15 }
 0x108   :  { %94 = vrot.lane.b32.xlu2 %v92_v16, %s299_s27  ;;  %v161_v34 = vpop.f32.mrf.mxu2 }
 0x109   :  { %v162_v37 = vadd.f32 %v161_v34, %v58_v24 }
 0x10a   :  { %v87_v25 = vpop.f32.mrf.mxu0 }
 0x10b   :  { %v88_v28 = vadd.f32 %v87_v25, %v58_v24 }
 0x110   :  { %100 = vperm.xlu2 %242, %v42_v19  }
 0x162   :  { %v95_v20 = vpop.permute.xlu2 %94 }
 0x163   :  { %225 = vmatpush.msk.msra.mxu1 %vm349_vm1, %v95_v20 }
 0x165   :  { %121 = vmatpush.msra.mxu1 %v92_v16 }
 0x166   :  { %226 = vmatmul.msk.f32.vlgmr.msra.gmra.mxu1 %vm60_vm2, %v41_v21 }
 0x16a   :  { %v101_v23 = vpop.permute.xlu2 %100 }
 0x178   :  { %v169_v22 = vpop.permute.xlu1 %168 }
 0x179   :  { %233 = vmatpush.msk.msra.mxu3 %vm349_vm1, %v169_v22 }
 0x17b   :  { %187 = vmatpush.msra.mxu3 %v166_v14 }
 0x17c   :  { %234 = vmatmul.msk.f32.vlgmr.msra.gmra.mxu3 %vm60_vm2, %v41_v21 }
 0x1e3   :  { %v123_v26 = vpop.f32.mrf.mxu1 }
 0x1e4   :  { %v124_v27 = vadd.f32 %v123_v26, %v101_v23 }
 0x1e6   :  { %vm126_vm5 = vcmp.gt.f32.partialorder %v124_v27, 0.0  ;;  %v127_v29 = vmul.f32 0.1, %v124_v27 }
 0x1e8   :  { %v128_v30 = vsel %vm126_vm5, %v124_v27, %v127_v29 }
 0x1e9   :  { %v129_v31 = vadd.f32 %v128_v30, %v88_v28 }
 0x1eb   :  { %vm130_vm6 = vcmp.gt.f32.partialorder %v129_v31, 0.0  ;;  %v131_v32 = vmul.f32 0.1, %v129_v31 }
 0x1ed   :  { %v132_v33 = vsel %vm130_vm6, %v129_v31, %v131_v32 }
 0x1ee   :  { %133 = vst.msk [vmem:[#allocation5] sm:$0xff] %vm60_vm2, %v132_v33 }
 0x1ff   :  { %v189_v35 = vpop.f32.mrf.mxu3 }
 0x200   :  { %v190_v36 = vadd.f32 %v189_v35, %v101_v23 }
 0x202   :  { %vm192_vm7 = vcmp.gt.f32.partialorder %v190_v36, 0.0  ;;  %v193_v38 = vmul.f32 0.1, %v190_v36 }
 0x204   :  { %v194_v39 = vsel %vm192_vm7, %v190_v36, %v193_v38 }
 0x205   :  { %v195_v40 = vadd.f32 %v194_v39, %v162_v37 }
 0x207   :  { %vm196_vm8 = vcmp.gt.f32.partialorder %v195_v40, 0.0  ;;  %v197_v41 = vmul.f32 0.1, %v195_v40 }
 0x209   :  { %v198_v42 = vsel %vm196_vm8, %v195_v40, %v197_v41 }
 0x20a   :  { %200 = vst.msk [vmem:[#allocation5 + $0x8] sm:$0xff] %vm60_vm2, %v198_v42 }
 0x20b   :  { %213 = dma.vmem_to_hbm [thread:$0]  %s206_s3, 256, %s208_s12, [#allocation4], %s297_s23, %s297_s23, %s298_s24  }
 0x20c   :  { %294 = dma.done.wait [#allocation4], 256  }
 0x20d   :  { %295 = vsyncadd [#allocation4], 4294967040 }
 0x20e   :  { %218 = vsyncpa [#allocation3], 1 }
 0x20f   :  { %219 = vsyncpa [#allocation4], 1 }

</bundles_post_ra>
